<compile_context>
chip_gen: v6e
topology: v6e:2x2x1
jax: 0.10.0
libtpu: 0.0.40
codegen_flags: <defaults>
</compile_context>

<pallas_src>
import jax
import jax.numpy as jnp
from jax.experimental import pallas as pl
from jax.experimental.pallas import tpu as pltpu


# --------------------------------------------------------------------------
# Exact-GELU helper (erf via Abramowitz & Stegun 7.1.26).
# --------------------------------------------------------------------------
_ERF_A1 = 0.254829592
_ERF_A2 = -0.284496736
_ERF_A3 = 1.421413741
_ERF_A4 = -1.453152027
_ERF_A5 = 1.061405429
_ERF_P = 0.3275911
_SQRT_HALF = 0.7071067811865476


def _erf_approx(x):
    sign = jnp.where(x >= 0.0, 1.0, -1.0).astype(x.dtype)
    ax = jnp.abs(x)
    t = 1.0 / (1.0 + _ERF_P * ax)
    poly = t * (_ERF_A1 + t * (_ERF_A2 + t * (_ERF_A3 + t * (_ERF_A4 + t * _ERF_A5))))
    return sign * (1.0 - poly * jnp.exp(-ax * ax))


def _gelu_exact(x):
    # 0.5 * x * (1 + erf(x / sqrt(2)))  -- matches torch.nn.functional.gelu (default).
    return 0.5 * x * (1.0 + _erf_approx(x * _SQRT_HALF))


# --------------------------------------------------------------------------
# VMEM-limit / tile-size helpers.
# --------------------------------------------------------------------------
def _round_up(x, m):
    return ((x + m - 1) // m) * m


def _vmem_limit_bytes():
    # ~3/4 of physical VMEM, capped at 96 MiB: v5e/v6e (128 MiB) -> 96 MiB,
    # v7x (64 MiB) -> 48 MiB. Falls back conservatively if the query fails.
    try:
        cap = pltpu.get_tpu_info().vmem_capacity_bytes
    except Exception:
        cap = 64 * 1024 * 1024
    return int(min(96 * 1024 * 1024, (cap * 3) // 4))


def _pick_th(H, preferred=512):
    """Largest multiple-of-128 divisor of H that is <= preferred (else full H)."""
    if H <= preferred:
        return H
    t = preferred
    while t >= 128:
        if H % t == 0:
            return t
        t -= 128
    return H


def _fused_tiles(M, D, H, bpe_in, vmem_limit):
    tm = M if M <= 512 else 512
    th = _pick_th(H, 512)

    def est(tm_, th_):
        x_b = 2 * tm_ * D * bpe_in            # x tile (conservatively double-buffered)
        w1_b = 2 * 2 * D * th_ * bpe_in       # Wx + Wg (double-buffered)
        w2_b = 2 * th_ * D * bpe_in           # W2 (double-buffered)
        o_b = 2 * tm_ * D * 4                 # output block
        acc_b = tm_ * D * 4                   # f32 accumulator scratch
        bias = (4 * th_ + D) * 4
        return x_b + w1_b + w2_b + o_b + acc_b + bias

    budget = int(vmem_limit * 0.7)
    while est(tm, th) > budget:
        if th > 128:
            new_th = th // 2
            while new_th >= 128 and H % new_th:
                new_th -= 128
            if new_th >= 128 and H % new_th == 0:
                th = new_th
                continue
        if tm > 64:
            tm = max(64, ((tm // 2) // 16) * 16)  # keep bf16 sublane alignment
            continue
        break
    return tm, th


# --------------------------------------------------------------------------
# Fused kernel:  out = GEGLU(x @ [Wx|Wg] + [bx|bg]) @ W2 + b2
#   x: (M, D)   Wx, Wg: (D, H)   W2: (H, D)   bx, bg: (1, H)   b2: (1, D)
#   grid = (M/tm, H/th); the hidden axis is the reduction axis of the second matmul.
#   x block and the (tm, D) output/accumulator stay resident across the hidden axis.
# --------------------------------------------------------------------------
def _ff_fused_kernel(x_ref, wx_ref, wg_ref, w2_ref, bx_ref, bg_ref, b2_ref,
                     o_ref, acc_ref):
    h = pl.program_id(1)

    @pl.when(h == 0)
    def _init():
        # Fold the second bias into the accumulator init.
        acc_ref[...] = jnp.broadcast_to(b2_ref[...].astype(jnp.float32), acc_ref.shape)

    x = x_ref[...]  # bf16 straight to the MXU; accumulate in f32
    a = jnp.dot(x, wx_ref[...], preferred_element_type=jnp.float32)
    a = a + bx_ref[...].astype(jnp.float32)
    g = jnp.dot(x, wg_ref[...], preferred_element_type=jnp.float32)
    g = g + bg_ref[...].astype(jnp.float32)

    # GEGLU slice for this hidden block, cast to the MXU dtype, accumulate into out.
    h_tile = (_gelu_exact(g) * a).astype(w2_ref.dtype)
    acc_ref[...] += jnp.dot(h_tile, w2_ref[...], preferred_element_type=jnp.float32)

    @pl.when(h == pl.num_programs(1) - 1)
    def _finalize():
        o_ref[...] = acc_ref[...].astype(o_ref.dtype)


def pallas_feedforward(x2, wx, wg, w2, bx, bg, b2, *, out_dtype=None):
    M, D = x2.shape
    D2, H = wx.shape
    assert D == D2 and wg.shape == (D, H) and w2.shape == (H, D)
    assert bx.shape == (H,) and bg.shape == (H,) and b2.shape == (D,)
    out_dtype = out_dtype or x2.dtype

    vmem_limit = _vmem_limit_bytes()
    bpe_in = jnp.dtype(wx.dtype).itemsize
    tm, th = _fused_tiles(M, D, H, bpe_in, vmem_limit)
    assert H % th == 0

    # Ragged M: zero-pad rows so the grid divides evenly; slice the result after.
    M_pad = _round_up(M, tm)
    if M_pad != M:
        x2 = jnp.pad(x2, ((0, M_pad - M), (0, 0)))

    grid = (M_pad // tm, H // th)
    m_blocks = grid[0]

    bx2 = bx.reshape(1, H).astype(jnp.float32)
    bg2 = bg.reshape(1, H).astype(jnp.float32)
    b22 = b2.reshape(1, D).astype(jnp.float32)

    cost = pl.CostEstimate(
        flops=6 * M_pad * D * H,                       # 4MDH (linear1) + 2MDH (linear2)
        transcendentals=M_pad * H,                     # one exp per GEGLU element
        bytes_accessed=(M_pad * D * bpe_in             # x read once per row block
                        + 3 * D * H * bpe_in * m_blocks  # Wx, Wg, W2 re-streamed / row block
                        + M_pad * D * jnp.dtype(out_dtype).itemsize
                        + (2 * H + D) * 4),
    )

    out = pl.pallas_call(
        _ff_fused_kernel,
        out_shape=jax.ShapeDtypeStruct((M_pad, D), out_dtype),
        grid_spec=pltpu.PrefetchScalarGridSpec(
            num_scalar_prefetch=0,
            grid=grid,
            in_specs=[
                pl.BlockSpec((tm, D), lambda i, h: (i, 0)),   # x (resident across h)
                pl.BlockSpec((D, th), lambda i, h: (0, h)),   # Wx
                pl.BlockSpec((D, th), lambda i, h: (0, h)),   # Wg
                pl.BlockSpec((th, D), lambda i, h: (h, 0)),   # W2
                pl.BlockSpec((1, th), lambda i, h: (0, h)),   # bx
                pl.BlockSpec((1, th), lambda i, h: (0, h)),   # bg
                pl.BlockSpec((1, D), lambda i, h: (0, 0)),    # b2
            ],
            out_specs=pl.BlockSpec((tm, D), lambda i, h: (i, 0)),
            scratch_shapes=[pltpu.VMEM((tm, D), jnp.float32)],
        ),
        compiler_params=pltpu.CompilerParams(
            dimension_semantics=("parallel", "arbitrary"),
            vmem_limit_bytes=vmem_limit,
        ),
        cost_estimate=cost,
    )(x2, wx, wg, w2, bx2, bg2, b22)

    if M_pad != M:
        out = out[:M]
    return out


# --------------------------------------------------------------------------
# FeedForward module (forward only).  Parameters initialized deterministically
# (torch nn.Linear-style uniform init).  Weights stored in bf16 for the MXU;
# biases stay f32 (added to f32 accumulators).
# --------------------------------------------------------------------------
class FeedForward:
    def __init__(self, dim, mult=4, dropout=0.0, key=None, compute_dtype=jnp.bfloat16):
        # TODO(synk): dropout=0.0 -> identity; training-mode dropout (RNG mask) not implemented.
        hidden = dim * mult
        self.dim = dim
        self.hidden = hidden
        self.compute_dtype = compute_dtype

        if key is None:
            key = jax.random.PRNGKey(0)
        k1, k2, k3, k4 = jax.random.split(key, 4)

        # nn.Linear(dim, 2*hidden): torch weight (2*hidden, dim) -> stored (dim, 2*hidden)
        bound1 = 1.0 / (dim ** 0.5)
        w1 = jax.random.uniform(k1, (dim, 2 * hidden), jnp.float32, -bound1, bound1)
        b1 = jax.random.uniform(k2, (2 * hidden,), jnp.float32, -bound1, bound1)
        # GEGLU chunk(2, dim=-1): first half -> value path, second half -> gate path.
        self.w_x = w1[:, :hidden].astype(compute_dtype)
        self.w_g = w1[:, hidden:].astype(compute_dtype)
        self.b_x = b1[:hidden]
        self.b_g = b1[hidden:]

        # nn.Linear(hidden, dim): torch weight (dim, hidden) -> stored (hidden, dim)
        bound2 = 1.0 / (hidden ** 0.5)
        self.w2 = jax.random.uniform(k3, (hidden, dim), jnp.float32,
                                     -bound2, bound2).astype(compute_dtype)
        self.b2 = jax.random.uniform(k4, (dim,), jnp.float32, -bound2, bound2)

    def __call__(self, x):
        b, n, dim = x.shape
        x2 = x.reshape(b * n, dim).astype(self.compute_dtype)
        out = pallas_feedforward(x2, self.w_x, self.w_g, self.w2,
                                 self.b_x, self.b_g, self.b2, out_dtype=x.dtype)
        return out.reshape(b, n, dim)


# --------------------------------------------------------------------------
# Pure-JAX reference (exact erf GELU, same bf16 operand rounding, f32 math).
# --------------------------------------------------------------------------
def reference_forward(ff, x):
    b, n, dim = x.shape
    hp = jax.lax.Precision.HIGHEST
    x2 = x.reshape(b * n, dim).astype(ff.compute_dtype).astype(jnp.float32)
    wx = ff.w_x.astype(jnp.float32)
    wg = ff.w_g.astype(jnp.float32)
    w2 = ff.w2.astype(jnp.float32)
    a = jnp.dot(x2, wx, precision=hp) + ff.b_x
    g = jnp.dot(x2, wg, precision=hp) + ff.b_g
    gelu_g = 0.5 * g * (1.0 + jax.scipy.special.erf(g * _SQRT_HALF))
    h = (gelu_g * a).astype(ff.compute_dtype).astype(jnp.float32)
    out = jnp.dot(h, w2, precision=hp) + ff.b2
    return out.reshape(b, n, dim).astype(x.dtype)


if __name__ == "__main__":
    key = jax.random.PRNGKey(0)
    kx, kp, kx2, kp2 = jax.random.split(key, 4)

    # ---- small shapes consistent with the module -------------------------
    batch, seq, dim, mult = 2, 8, 32, 4            # hidden = 128
    x = jax.random.normal(kx, (batch, seq, dim), jnp.float32)
    ff = FeedForward(dim=dim, mult=mult, dropout=0.0, key=kp)
    out = jax.block_until_ready(ff(x))
    ref = reference_forward(ff, x)
    assert out.shape == (batch, seq, dim)
    assert jnp.allclose(out, ref, atol=5e-3, rtol=5e-3), "small-shape mismatch vs reference"

    # ---- slightly larger case: exercises multiple hidden blocks ----------
    batch2, seq2, dim2, mult2 = 2, 40, 256, 4      # hidden = 1024 -> 2 hidden blocks
    x2 = jax.random.normal(kx2, (batch2, seq2, dim2), jnp.float32)
    ff2 = FeedForward(dim=dim2, mult=mult2, dropout=0.0, key=kp2)
    out2 = jax.block_until_ready(ff2(x2))
    ref2 = reference_forward(ff2, x2)
    assert out2.shape == (batch2, seq2, dim2)
    assert jnp.allclose(out2, ref2, atol=5e-3, rtol=5e-3), "medium-shape mismatch vs reference"

    print("KERNEL_OK")
</pallas_src>

<mosaic_0001>
module attributes {stable_mosaic.version = 11 : i64} {
  func.func @_ff_fused_kernel(%arg0: i32, %arg1: i32, %arg2: memref<16x32xbf16, #tpu.memory_space<vmem>>, %arg3: memref<32x128xbf16, #tpu.memory_space<vmem>>, %arg4: memref<32x128xbf16, #tpu.memory_space<vmem>>, %arg5: memref<128x32xbf16, #tpu.memory_space<vmem>>, %arg6: memref<1x128xf32, #tpu.memory_space<vmem>>, %arg7: memref<1x128xf32, #tpu.memory_space<vmem>>, %arg8: memref<1x32xf32, #tpu.memory_space<vmem>>, %arg9: memref<16x32xf32, #tpu.memory_space<vmem>>, %arg10: memref<16x32xf32, #tpu.memory_space<vmem>>) attributes {dimension_semantics = [#tpu.dimension_semantics<parallel>, #tpu.dimension_semantics<arbitrary>], iteration_bounds = array<i64: 1, 1>, scalar_prefetch = 0 : i64, scratch_operands = 1 : i64, tpu.core_type = #tpu.core_type<tc>, window_params = [{transform_indices = @transform_0, window_bounds = array<i64: 16, 32>}, {transform_indices = @transform_1, window_bounds = array<i64: 32, 128>}, {transform_indices = @transform_2, window_bounds = array<i64: 32, 128>}, {transform_indices = @transform_3, window_bounds = array<i64: 128, 32>}, {transform_indices = @transform_4, window_bounds = array<i64: 1, 128>}, {transform_indices = @transform_5, window_bounds = array<i64: 1, 128>}, {pipeline_mode = #tpu.pipeline_mode<synchronous>, transform_indices = @transform_6, window_bounds = array<i64: 1, 32>}, {transform_indices = @transform_7, window_bounds = array<i64: 16, 32>}]} {
    %c0_i32 = arith.constant 0 : i32
    %0 = arith.cmpi eq, %arg1, %c0_i32 : i32
    %1 = arith.extui %0 : i1 to i32
    %c0_i32_0 = arith.constant 0 : i32
    %2 = arith.cmpi ne, %1, %c0_i32_0 : i32
    scf.if %2 {
      %c0_36 = arith.constant 0 : index
      %c0_37 = arith.constant 0 : index
      %65 = vector.load %arg8[%c0_36, %c0_37] : memref<1x32xf32, #tpu.memory_space<vmem>>, vector<1x32xf32>
      %66 = vector.shape_cast %65 : vector<1x32xf32> to vector<1x32xf32>
      %67 = vector.broadcast %66 : vector<1x32xf32> to vector<16x32xf32>
      %c0_38 = arith.constant 0 : index
      %c0_39 = arith.constant 0 : index
      %68 = vector.load %arg10[%c0_38, %c0_39] : memref<16x32xf32, #tpu.memory_space<vmem>>, vector<16x32xf32>
      tpu.vector_store %arg10[%c0_38, %c0_39], %67 {strides = array<i32>} : memref<16x32xf32, #tpu.memory_space<vmem>>, vector<16x32xf32>,
    } else {
    }
    %c0 = arith.constant 0 : index
    %c0_1 = arith.constant 0 : index
    %3 = vector.load %arg2[%c0, %c0_1] : memref<16x32xbf16, #tpu.memory_space<vmem>>, vector<16x32xbf16>
    %c0_2 = arith.constant 0 : index
    %c0_3 = arith.constant 0 : index
    %4 = vector.load %arg3[%c0_2, %c0_3] : memref<32x128xbf16, #tpu.memory_space<vmem>>, vector<32x128xbf16>
    %cst = arith.constant dense<0.000000e+00> : vector<16x128xf32>
    %5 = tpu.matmul %3, %4, %cst {dimension_numbers = #tpu.dot_dimension_numbers<[1], [0], [0], [1], [0, 0, 1, 1], [], []>} : vector<16x32xbf16>, vector<32x128xbf16>, vector<16x128xf32> -> vector<16x128xf32>
    %c0_4 = arith.constant 0 : index
    %c0_5 = arith.constant 0 : index
    %6 = vector.load %arg6[%c0_4, %c0_5] : memref<1x128xf32, #tpu.memory_space<vmem>>, vector<1x128xf32>
    %7 = vector.broadcast %6 : vector<1x128xf32> to vector<16x128xf32>
    %8 = arith.addf %5, %7 : vector<16x128xf32>
    %c0_6 = arith.constant 0 : index
    %c0_7 = arith.constant 0 : index
    %9 = vector.load %arg4[%c0_6, %c0_7] : memref<32x128xbf16, #tpu.memory_space<vmem>>, vector<32x128xbf16>
    %cst_8 = arith.constant dense<0.000000e+00> : vector<16x128xf32>
    %10 = tpu.matmul %3, %9, %cst_8 {dimension_numbers = #tpu.dot_dimension_numbers<[1], [0], [0], [1], [0, 0, 1, 1], [], []>} : vector<16x32xbf16>, vector<32x128xbf16>, vector<16x128xf32> -> vector<16x128xf32>
    %c0_9 = arith.constant 0 : index
    %c0_10 = arith.constant 0 : index
    %11 = vector.load %arg7[%c0_9, %c0_10] : memref<1x128xf32, #tpu.memory_space<vmem>>, vector<1x128xf32>
    %12 = vector.broadcast %11 : vector<1x128xf32> to vector<16x128xf32>
    %13 = arith.addf %10, %12 : vector<16x128xf32>
    %cst_11 = arith.constant 5.000000e-01 : f32
    %14 = vector.broadcast %cst_11 : f32 to vector<16x128xf32>
    %15 = arith.mulf %14, %13 : vector<16x128xf32>
    %cst_12 = arith.constant 0.707106769 : f32
    %16 = vector.broadcast %cst_12 : f32 to vector<16x128xf32>
    %17 = arith.mulf %13, %16 : vector<16x128xf32>
    %cst_13 = arith.constant 0.000000e+00 : f32
    %18 = vector.broadcast %cst_13 : f32 to vector<16x128xf32>
    %19 = arith.cmpf oge, %17, %18 : vector<16x128xf32>
    %cst_14 = arith.constant 1.000000e+00 : f32
    %cst_15 = arith.constant -1.000000e+00 : f32
    %20 = vector.broadcast %cst_14 : f32 to vector<16x128xf32>
    %21 = vector.broadcast %cst_15 : f32 to vector<16x128xf32>
    %22 = arith.select %19, %20, %21 : vector<16x128xi1>, vector<16x128xf32>
    %23 = math.absf %17 : vector<16x128xf32>
    %cst_16 = arith.constant 0.327591091 : f32
    %24 = vector.broadcast %cst_16 : f32 to vector<16x128xf32>
    %25 = arith.mulf %24, %23 : vector<16x128xf32>
    %cst_17 = arith.constant 1.000000e+00 : f32
    %26 = vector.broadcast %cst_17 : f32 to vector<16x128xf32>
    %27 = arith.addf %26, %25 : vector<16x128xf32>
    %cst_18 = arith.constant 1.000000e+00 : f32
    %28 = vector.broadcast %cst_18 : f32 to vector<16x128xf32>
    %29 = arith.divf %28, %27 : vector<16x128xf32>
    %cst_19 = arith.constant 1.06140542 : f32
    %30 = vector.broadcast %cst_19 : f32 to vector<16x128xf32>
    %31 = arith.mulf %29, %30 : vector<16x128xf32>
    %cst_20 = arith.constant -1.45315206 : f32
    %32 = vector.broadcast %cst_20 : f32 to vector<16x128xf32>
    %33 = arith.addf %32, %31 : vector<16x128xf32>
    %34 = arith.mulf %29, %33 : vector<16x128xf32>
    %cst_21 = arith.constant 1.42141378 : f32
    %35 = vector.broadcast %cst_21 : f32 to vector<16x128xf32>
    %36 = arith.addf %35, %34 : vector<16x128xf32>
    %37 = arith.mulf %29, %36 : vector<16x128xf32>
    %cst_22 = arith.constant -0.284496725 : f32
    %38 = vector.broadcast %cst_22 : f32 to vector<16x128xf32>
    %39 = arith.addf %38, %37 : vector<16x128xf32>
    %40 = arith.mulf %29, %39 : vector<16x128xf32>
    %cst_23 = arith.constant 0.254829586 : f32
    %41 = vector.broadcast %cst_23 : f32 to vector<16x128xf32>
    %42 = arith.addf %41, %40 : vector<16x128xf32>
    %43 = arith.mulf %29, %42 : vector<16x128xf32>
    %cst_24 = arith.constant 0.000000e+00 : f32
    %44 = vector.broadcast %cst_24 : f32 to vector<16x128xf32>
    %45 = arith.subf %44, %23 : vector<16x128xf32>
    %46 = arith.mulf %45, %23 : vector<16x128xf32>
    %47 = math.exp %46 : vector<16x128xf32>
    %48 = arith.mulf %43, %47 : vector<16x128xf32>
    %cst_25 = arith.constant 1.000000e+00 : f32
    %49 = vector.broadcast %cst_25 : f32 to vector<16x128xf32>
    %50 = arith.subf %49, %48 : vector<16x128xf32>
    %51 = arith.mulf %22, %50 : vector<16x128xf32>
    %cst_26 = arith.constant 1.000000e+00 : f32
    %52 = vector.broadcast %cst_26 : f32 to vector<16x128xf32>
    %53 = arith.addf %52, %51 : vector<16x128xf32>
    %54 = arith.mulf %15, %53 : vector<16x128xf32>
    %55 = arith.mulf %54, %8 : vector<16x128xf32>
    %56 = arith.truncf %55 : vector<16x128xf32> to vector<16x128xbf16>
    %c0_27 = arith.constant 0 : index
    %c0_28 = arith.constant 0 : index
    %57 = vector.load %arg10[%c0_27, %c0_28] : memref<16x32xf32, #tpu.memory_space<vmem>>, vector<16x32xf32>
    %c0_29 = arith.constant 0 : index
    %c0_30 = arith.constant 0 : index
    %58 = vector.load %arg5[%c0_29, %c0_30] : memref<128x32xbf16, #tpu.memory_space<vmem>>, vector<128x32xbf16>
    %cst_31 = arith.constant dense<0.000000e+00> : vector<16x32xf32>
    %59 = tpu.matmul %56, %58, %cst_31 {dimension_numbers = #tpu.dot_dimension_numbers<[1], [0], [0], [1], [0, 0, 1, 1], [], []>} : vector<16x128xbf16>, vector<128x32xbf16>, vector<16x32xf32> -> vector<16x32xf32>
    %60 = arith.addf %57, %59 : vector<16x32xf32>
    %c0_32 = arith.constant 0 : index
    %c0_33 = arith.constant 0 : index
    %61 = vector.load %arg10[%c0_32, %c0_33] : memref<16x32xf32, #tpu.memory_space<vmem>>, vector<16x32xf32>
    tpu.vector_store %arg10[%c0_32, %c0_33], %60 {strides = array<i32>} : memref<16x32xf32, #tpu.memory_space<vmem>>, vector<16x32xf32>,
    %c0_i32_34 = arith.constant 0 : i32
    %62 = arith.cmpi eq, %arg1, %c0_i32_34 : i32
    %63 = arith.extui %62 : i1 to i32
    %c0_i32_35 = arith.constant 0 : i32
    %64 = arith.cmpi ne, %63, %c0_i32_35 : i32
    scf.if %64 {
      %c0_36 = arith.constant 0 : index
      %c0_37 = arith.constant 0 : index
      %65 = vector.load %arg10[%c0_36, %c0_37] : memref<16x32xf32, #tpu.memory_space<vmem>>, vector<16x32xf32>
      %c0_38 = arith.constant 0 : index
      %c0_39 = arith.constant 0 : index
      %66 = vector.load %arg9[%c0_38, %c0_39] : memref<16x32xf32, #tpu.memory_space<vmem>>, vector<16x32xf32>
      tpu.vector_store %arg9[%c0_38, %c0_39], %65 {strides = array<i32>} : memref<16x32xf32, #tpu.memory_space<vmem>>, vector<16x32xf32>,
    } else {
    }
    return
  }
  func.func @transform_0(%arg0: i32, %arg1: i32) -> (i32, i32) {
    %c0_i32 = arith.constant 0 : i32
    %c0_i32_0 = arith.constant 0 : i32
    return %arg0, %c0_i32 : i32, i32
  }
  func.func @transform_1(%arg0: i32, %arg1: i32) -> (i32, i32) {
    %c0_i32 = arith.constant 0 : i32
    %c0_i32_0 = arith.constant 0 : i32
    return %c0_i32, %arg1 : i32, i32
  }
  func.func @transform_2(%arg0: i32, %arg1: i32) -> (i32, i32) {
    %c0_i32 = arith.constant 0 : i32
    %c0_i32_0 = arith.constant 0 : i32
    return %c0_i32, %arg1 : i32, i32
  }
  func.func @transform_3(%arg0: i32, %arg1: i32) -> (i32, i32) {
    %c0_i32 = arith.constant 0 : i32
    %c0_i32_0 = arith.constant 0 : i32
    return %arg1, %c0_i32 : i32, i32
  }
  func.func @transform_4(%arg0: i32, %arg1: i32) -> (i32, i32) {
    %c0_i32 = arith.constant 0 : i32
    %c0_i32_0 = arith.constant 0 : i32
    return %c0_i32, %arg1 : i32, i32
  }
  func.func @transform_5(%arg0: i32, %arg1: i32) -> (i32, i32) {
    %c0_i32 = arith.constant 0 : i32
    %c0_i32_0 = arith.constant 0 : i32
    return %c0_i32, %arg1 : i32, i32
  }
  func.func @transform_6(%arg0: i32, %arg1: i32) -> (i32, i32) {
    %c0_i32 = arith.constant 0 : i32
    %c0_i32_0 = arith.constant 0 : i32
    %c0_i32_1 = arith.constant 0 : i32
    return %c0_i32, %c0_i32_0 : i32, i32
  }
  func.func @transform_7(%arg0: i32, %arg1: i32) -> (i32, i32) {
    %c0_i32 = arith.constant 0 : i32
    %c0_i32_0 = arith.constant 0 : i32
    return %arg0, %c0_i32 : i32, i32
  }
}

</mosaic_0001>

<bundles_post_ra>
// kernel: tpu_custom_call.1
= control target key start
LH: loop header
LB: loop body
LE: loop exit
PB: predicated region body
PF: predicated region fallthrough
CT: control target
= control target key end

     0   :  { %v490_v1 = vmov 0.0   ;;  %vm491_vm0 = vmmov 0   ;;  %vm39_vm1 = vcmask 261120   ;;  %s601_s0 = inlined_call_operand.vmem [shape: bf16[16,32], index: 0, kind: input, shape index: {}]   ;;  %s602_s1 = inlined_call_operand.vmem [shape: bf16[32,128], index: 1, kind: input, shape index: {}]   ;;  %s603_s2 = inlined_call_operand.vmem [shape: bf16[32,128], index: 2, kind: input, shape index: {}]   ;;  %s604_s3 = inlined_call_operand.vmem [shape: bf16[128,32], index: 3, kind: input, shape index: {}]   ;;  %s605_s4 = inlined_call_operand.vmem [shape: f32[1,128], index: 4, kind: input, shape index: {}]   ;;  %s606_s5 = inlined_call_operand.vmem [shape: f32[1,128], index: 5, kind: input, shape index: {}]   ;;  %s607_s6 = inlined_call_operand.vmem [shape: f32[1,32], index: 6, kind: input, shape index: {}]   ;;  %s608_s7 = inlined_call_operand.hbm [shape: f32[16,32], index: 7, kind: output, shape index: {}]  }
   0x1   :  { %v447_v0 = vld [vmem:[%s602_s1 + $0x8] sm:$0xff]   ;;  %405 = vmatprep.subr.bf16.mxu1 %v490_v1  ;;  %421 = vmatprep.subr.bf16.mxu0 %v490_v1  ;;  %v448_v2 = vld [vmem:[%s602_s1] sm:$0xff]  }
   0x2   :  { %406 = vmatpush3.bf16.msra.mxu1 %v447_v0  ;;  %409 = vmatprep.mubr.msk.bf16.mxu1 %vm491_vm0, %v490_v1  ;;  %v449_v3 = vld [vmem:[%s601_s0] sm:$0xff]   ;;  %v450_v4 = vld [vmem:[%s603_s2 + $0x8] sm:$0xff]  }
   0x3   :  { %407 = vmatprep.subr.bf16.mxu1 %v490_v1  ;;  %437 = vmatprep.mubr.msk.bf16.mxu0 %vm491_vm0, %v490_v1  ;;  %v451_v5 = vld [vmem:[%s603_s2] sm:$0xff]  }
   0x6   :  { %408 = vmatpush3.bf16.msra.mxu1 %v448_v2 }
   0x7   :  { %413 = vmatprep.subr.bf16.mxu1 %v490_v1 }
   0x9   :  { %410 = vmatmul.mubr.msk.bf16.vlgmr.msra.gmra.mxu1 %vm39_vm1, %v449_v3 }
   0xa   :  { %414 = vmatpush3.bf16.msra.mxu1 %v450_v4  ;;  %417 = vmatprep.mubr.msk.bf16.mxu1 %vm491_vm0, %v490_v1 }
   0xb   :  { %12 = vsyncpa [#allocation4], 0  ;;  %415 = vmatprep.subr.bf16.mxu1 %v490_v1  ;;  %v452_v6 = vld [vmem:[%s604_s3 + $0x38] sm:$0xff]   ;;  %v453_v7 = vld [vmem:[%s604_s3 + $0x30] sm:$0xff]   ;;  %v492_v0 = vmov -1.0  }
   0xc   :  { %422 = vmatpush3.bf16.msra.mxu0 %v452_v6  ;;  %v454_v8 = vld [vmem:[%s604_s3 + $0x28] sm:$0xff]   ;;  %v455_v9 = vld [vmem:[%s604_s3 + $0x20] sm:$0xff]   ;;  %v456_v10 = vld [vmem:[%s604_s3 + $0x18] sm:$0xff]  }
   0xd   :  { %423 = vmatprep.subr.bf16.mxu0 %v490_v1  ;;  %v457_v11 = vld [vmem:[%s604_s3 + $0x10] sm:$0xff]   ;;  %v458_v12 = vld [vmem:[%s604_s3 + $0x8] sm:$0xff]   ;;  %v459_v13 = vld [vmem:[%s604_s3] sm:$0xff]  }
   0xe   :  { %416 = vmatpush3.bf16.msra.mxu1 %v451_v5  ;;  %v372_v14 = vld [vmem:[%s607_s6] ss:$0 sm:$0xff] }
   0xf   :  { %40 = vst.msk [vmem:[#allocation2] sm:$0xff] %vm39_vm1, %v372_v14  ;;  %41 = vst.msk [vmem:[#allocation2 + $0x8] sm:$0xff] %vm39_vm1, %v372_v14  ;;  %v378_v19 = vld [vmem:[%s606_s5] ss:$0 sm:$0xff] }
  0x10   :  { %424 = vmatpush3.bf16.msra.mxu0 %v453_v7 }
  0x11   :  { %418 = vmatmul.mubr.msk.bf16.vlgmr.msra.gmra.mxu1 %vm39_vm1, %v449_v3  ;;  %425 = vmatprep.subr.bf16.mxu0 %v490_v1 }
  0x14   :  { %426 = vmatpush3.bf16.msra.mxu0 %v454_v8 }
  0x15   :  { %427 = vmatprep.subr.bf16.mxu0 %v490_v1 }
  0x18   :  { %428 = vmatpush3.bf16.msra.mxu0 %v455_v9  ;;  %v373_v9 = vld [vmem:[%s605_s4] ss:$0 sm:$0xff]  ;;  %s493_s4 = smov [#allocation3]  }
  0x19   :  { %429 = vmatprep.subr.bf16.mxu0 %v490_v1  ;;  %s361_s6 = sshll.u32 %s493_s4, 4  ;;  %s362_s6 = int_to_ptr.vmem [resolvable:$true] %s361_s6 }
  0x1a   :  { %s468_s28 = scalar_lea.vmem %s362_s6, 256  ;;  %p473_p1 = scmp.lt.s32.totalorder %s362_s6, %s362_s6 }
  0x1b   :  { %p469_p0 = scmp.ne.s32.totalorder %s362_s6, %s468_s28  ;;  %p474_p2 = scmp.lt.s32.totalorder %s468_s28, %s468_s28 }
  0x1c   :  { %430 = vmatpush3.bf16.msra.mxu0 %v456_v10 }
  0x1d   :  { %431 = vmatprep.subr.bf16.mxu0 %v490_v1  ;;  %p475_p3 = por %p474_p2, %p473_p1 }
  0x1f   :  { %p476_p4 = pnand %p475_p3, %p469_p0 }
  0x20   :  { %432 = vmatpush3.bf16.msra.mxu0 %v457_v11 }
  0x21   :  { %433 = vmatprep.subr.bf16.mxu0 %v490_v1 }
  0x24   :  { %434 = vmatpush3.bf16.msra.mxu0 %v458_v12 }
  0x25   :  { %435 = vmatprep.subr.bf16.mxu0 %v490_v1 }
  0x28   :  { %436 = vmatpush3.bf16.msra.mxu0 %v459_v13 }
  0xc9   :  { %v582_v15 = vpop.f32.mrf.mxu1 }
  0xca   :  { %v111_v13 = vadd.f32 %v373_v9, %v582_v15 }
  0xcb   :  { %v411_v16 = vpop.f32.mrf.mxu1 }
  0xcd   :  { %v584_v17 = vpop.f32.mrf.mxu1 }
  0xce   :  { %v114_v14 = vadd.f32 %v373_v9, %v584_v17 }
  0xcf   :  { %v412_v18 = vpop.f32.mrf.mxu1 }
  0xd1   :  { %v174_v20 = vpop.f32.mrf.mxu1 }
  0xd2   :  { %v175_v21 = vadd.f32 %v378_v19, %v174_v20 }
  0xd3   :  { %v419_v22 = vpop.f32.mrf.mxu1 }
  0xd4   :  { %v183_v23 = vmul.f32 0.70710677, %v175_v21  ;;  %v181_v7 = vmul.f32 0.5, %v175_v21  ;;  %v238_v22 = vld [vmem:[#allocation2] sm:$0xff] }
  0xd5   :  { %v177_v24 = vpop.f32.mrf.mxu1 }
  0xd6   :  { %v189_v25 = vand.u32 2147483647, %v183_v23  ;;  %v178_v26 = vadd.f32 %v378_v19, %v177_v24  ;;  %vm185_vm2 = vcmp.ge.f32.partialorder %v183_v23, 0.0 }
  0xd7   :  { %v420_v27 = vpop.f32.mrf.mxu1  ;;  %v187_v1 = vsel %vm185_vm2, 1.0, %v492_v0 }
  0xd8   :  { %v191_v28 = vmul.f32 0.3275911, %v189_v25  ;;  %v184_v29 = vmul.f32 0.70710677, %v178_v26  ;;  %v217_v34 = vsub.f32 0.0, %v189_v25  ;;  %v182_v11 = vmul.f32 0.5, %v178_v26 }
  0xda   :  { %v193_v30 = vadd.f32 1.0, %v191_v28  ;;  %v190_v31 = vand.u32 2147483647, %v184_v29  ;;  %v219_v35 = vmul.f32 %v217_v34, %v189_v25  ;;  %vm186_vm3 = vcmp.ge.f32.partialorder %v184_v29, 0.0  ;;  %v239_v25 = vld [vmem:[#allocation2 + $0x8] sm:$0xff] }
  0xdb   :  { %v188_v6 = vsel %vm186_vm3, 1.0, %v492_v0 }
  0xdc   :  { %460 = vrcp.f32 %v193_v30  ;;  %v192_v32 = vmul.f32 0.3275911, %v190_v31  ;;  %v218_v36 = vsub.f32 0.0, %v190_v31  ;;  %v221_v39 = vmul.f32 1.442695, %v219_v35 }
  0xde   :  { %v194_v33 = vadd.f32 1.0, %v192_v32  ;;  %v220_v40 = vmul.f32 %v218_v36, %v190_v31 }
  0xe0   :  { %462 = vrcp.f32 %v194_v33  ;;  %v223_v45 = vmul.f32 1.442695, %v220_v40 }
  0xe1   :  { %464 = vpow2.f32 %v221_v39 }
  0xe2   :  { %466 = vpow2.f32 %v223_v45 }
  0xe9   :  { %v461_v37 = vpop.eup %460 }
  0xea   :  { %v199_v38 = vmul.f32 1.0614054, %v461_v37 }
  0xec   :  { %v201_v41 = vadd.f32 -1.4531521, %v199_v38 }
  0xed   :  { %v463_v42 = vpop.eup %462 }
  0xee   :  { %v203_v43 = vmul.f32 %v461_v37, %v201_v41  ;;  %v200_v44 = vmul.f32 1.0614054, %v463_v42  ;;  %v465_v58 = vpop.eup %464 }
  0xef   :  { %v467_v63 = vpop.eup %466 }
  0xf0   :  { %v205_v46 = vadd.f32 1.4214138, %v203_v43  ;;  %v202_v47 = vadd.f32 -1.4531521, %v200_v44 }
  0xf2   :  { %v207_v48 = vmul.f32 %v461_v37, %v205_v46  ;;  %v204_v49 = vmul.f32 %v463_v42, %v202_v47 }
  0xf4   :  { %v209_v50 = vadd.f32 -0.28449672, %v207_v48  ;;  %v206_v51 = vadd.f32 1.4214138, %v204_v49 }
  0xf6   :  { %v211_v52 = vmul.f32 %v461_v37, %v209_v50  ;;  %v208_v53 = vmul.f32 %v463_v42, %v206_v51 }
  0xf8   :  { %v213_v54 = vadd.f32 0.2548296, %v211_v52  ;;  %v210_v55 = vadd.f32 -0.28449672, %v208_v53 }
  0xfa   :  { %v215_v56 = vmul.f32 %v461_v37, %v213_v54  ;;  %v212_v57 = vmul.f32 %v463_v42, %v210_v55 }
  0xfc   :  { %v225_v59 = vmul.f32 %v465_v58, %v215_v56  ;;  %v214_v60 = vadd.f32 0.2548296, %v212_v57 }
  0xfe   :  { %v227_v61 = vsub.f32 1.0, %v225_v59  ;;  %v216_v62 = vmul.f32 %v463_v42, %v214_v60 }
 0x100   :  { %v229_v2 = vmul.f32 %v227_v61, %v187_v1  ;;  %v226_v3 = vmul.f32 %v467_v63, %v216_v62 }
 0x102   :  { %v231_v4 = vadd.f32 1.0, %v229_v2  ;;  %v228_v5 = vsub.f32 1.0, %v226_v3 }
 0x104   :  { %v230_v8 = vmul.f32 %v228_v5, %v188_v6  ;;  %v233_v10 = vmul.f32 %v231_v4, %v181_v7 }
 0x106   :  { %v232_v12 = vadd.f32 1.0, %v230_v8  ;;  %v235_v18 = vmul.f32 %v233_v10, %v111_v13 }
 0x108   :  { %v234_v16 = vmul.f32 %v232_v12, %v182_v11 }
 0x10a   :  { %v236_v19 = vmul.f32 %v234_v16, %v114_v14 }
 0x10c   :  { %v237_v20 = vpack.c.bf16 %v236_v19, %v235_v18 }
 0x10e   :  { %438 = vmatmul.mubr.bf16.vlgmr.msra.gmra.mxu0 %v237_v20 }
 0x1ce   :  { %v338_v23 = vpop.f32.mrf.mxu0 }
 0x1cf   :  { %v345_v21 = vadd.f32 %v338_v23, %v238_v22 }
 0x1d0   :  { %v439_v24 = vpop.f32.mrf.mxu0 }
 0x1d1   :  { %347 = vst.msk [vmem:[#allocation2] sm:$0xff] %vm39_vm1, %v345_v21 }
 0x1d2   :  { %v341_v27 = vpop.f32.mrf.mxu0 }
 0x1d3   :  { %v346_v28 = vadd.f32 %v341_v27, %v239_v25 }
 0x1d4   :  { %v440_v26 = vpop.f32.mrf.mxu0 }
 0x1d5   :  { %348 = vst.msk [vmem:[#allocation2 + $0x8] sm:$0xff] %vm39_vm1, %v346_v28 }
 0x1d8   :  { %v352_v15 = vld [vmem:[#allocation2] sm:$0xff] }
 0x1d9   :  { %354 = vst.msk [vmem:[#allocation3] sm:$0xff] %vm39_vm1, %v352_v15 }
 0x1dc   :  { %v353_v17 = vld [vmem:[#allocation2 + $0x8] sm:$0xff] }
 0x1dd   :  { %355 = vst.msk [vmem:[#allocation3 + $0x8] sm:$0xff] %vm39_vm1, %v353_v17 }
 0x1de   :  { %479 = shalt.err (!%p476_p4)
}
 0x1df   :  { %s494_s29 = smov 128   ;;  %s495_s30 = smov 8  }
 0x1e0   :  { %367 = dma.vmem_to_hbm [thread:$0]  %s362_s6, 256, %s608_s7, [#allocation4], %s494_s29, %s494_s29, %s495_s30  }
 0x1e1   :  { %488 = dma.done.wait [#allocation4], 256  }
 0x1e2   :  { %489 = vsyncadd [#allocation4], 4294967040 }
 0x1e3   :  { %371 = vsyncpa [#allocation4], 1 }

</bundles_post_ra>
